<compile_context>
chip_gen: v5e
topology: v5e:2x2
jax: 0.10.0
libtpu: 0.0.40
codegen_flags: <defaults>
</compile_context>

<pallas_src>
import math
import jax
import jax.numpy as jnp
from jax.experimental import pallas as pl
from jax.experimental.pallas import tpu as pltpu


def _species_tokenizer_kernel(xk_ref, f2pi_ref, wbd_ref, b_ref, o_ref):
    # xk_ref  : (B, S*K)      x repeated K times per species (lane-major)
    # f2pi_ref: (1, S*K)      2*pi*freq, flattened (2*pi folded at prep time, not per call)
    # wbd_ref : (2*S*K, S*D)  block-diagonal weight, rows = [cos half ; sin half]
    # b_ref   : (1, S*D)      flattened per-species bias
    # o_ref   : (B, S*D)      lane-dense output slab
    phase = xk_ref[...] * f2pi_ref[...]                                  # (B, S*K) exact f32 VPU
    # One cos + one sin over the whole phase tensor (2 EUP pushes, not 2*S).
    # Concat boundary is S*K = 384 lanes (3x128) -> aligned, no relayout.
    feat = jnp.concatenate([jnp.cos(phase), jnp.sin(phase)], axis=-1)    # (B, 2*S*K)
    # Single MXU push: contraction dim 2*S*K = 768 (6x128); the zero blocks of the
    # block-diagonal weight cost nothing at this scale.  f32 accumulation.
    out = jnp.dot(feat, wbd_ref[...], preferred_element_type=jnp.float32)  # (B, S*D)
    out = out + b_ref[...]
    o_ref[...] = jnp.maximum(out, 0.0)   # one unmasked 128-lane vst + small tail per row


def species_tokenizer_forward(x, freq2pi_flat, w_bd, bias_flat):
    """Forward pass.

    x:            (B, S)        raw per-species features, f32
    freq2pi_flat: (1, S*K)      2*pi*freq, flattened lane-major (from prepare_params)
    w_bd:         (2*S*K, S*D)  block-diagonal [cos ; sin] weight (from prepare_params)
    bias_flat:    (1, S*D)      flattened per-species bias (from prepare_params)
    returns:      (B, S, D)     ReLU(periodic embedding @ per-species linear + bias)
    """
    B, S = x.shape
    SK = freq2pi_flat.shape[1]
    SD = w_bd.shape[1]
    K = SK // S
    D = SD // S

    # Tiny lane-major expansion: x_exp[b, s*K + k] = x[b, s] (~6 KiB, fused under jit).
    # Keeps the phase multiply an exact elementwise f32 op instead of routing x
    # through the MXU.
    x_exp = jnp.repeat(x, K, axis=1)                                     # (B, S*K)

    out_flat = pl.pallas_call(
        _species_tokenizer_kernel,
        out_shape=jax.ShapeDtypeStruct((B, SD), jnp.float32),
        # Gridless: whole arrays VMEM-resident, single invocation, no pipeline
        # scaffolding.  Total footprint ~600 KiB, far below any VMEM limit.
        in_specs=[
            pl.BlockSpec(memory_space=pltpu.MemorySpace.VMEM),   # x_exp
            pl.BlockSpec(memory_space=pltpu.MemorySpace.VMEM),   # freq2pi_flat
            pl.BlockSpec(memory_space=pltpu.MemorySpace.VMEM),   # w_bd
            pl.BlockSpec(memory_space=pltpu.MemorySpace.VMEM),   # bias_flat
        ],
        out_specs=pl.BlockSpec(memory_space=pltpu.MemorySpace.VMEM),
    )(x_exp, freq2pi_flat, w_bd, bias_flat)

    # Contiguous reshape (free) back to PyTorch's (B, S, D) order.
    return out_flat.reshape(B, S, D)


def prepare_params(freq, w, bias):
    """One-time layout prep (the init-time work the per-call wrapper must not redo).

    freq: (S, K); w: (S, 2K, D); bias: (S, D)
      -> freq2pi_flat (1, S*K), w_bd (2*S*K, S*D) block-diagonal, bias_flat (1, S*D)
    """
    S, K = freq.shape
    D = w.shape[-1]
    # Fold 2*pi into the frequencies once, flatten lane-major.
    freq2pi_flat = (2.0 * math.pi * freq).reshape(1, S * K)

    eye = jnp.eye(S, dtype=w.dtype)                                      # (S, S)

    def block_diag(w_half):                                              # (S, K, D) -> (S*K, S*D)
        # bd[s*K + k, t*D + d] = w_half[s, k, d] * (s == t)
        return jnp.einsum('skd,st->sktd', w_half, eye).reshape(S * K, S * D)

    # Rows ordered [cos block-diag ; sin block-diag], matching concat([cos, sin]).
    w_bd = jnp.concatenate([block_diag(w[:, :K, :]),
                            block_diag(w[:, K:, :])], axis=0)            # (2*S*K, S*D)
    bias_flat = bias.reshape(1, S * D)
    return freq2pi_flat, w_bd, bias_flat


def init_params(key, n_species, d_token, n_frequencies=48, sigma=0.01):
    """Deterministic init matching the PyTorch module's reset_parameters()."""
    k_freq, k_w, k_b = jax.random.split(key, 3)
    # _Periodic: trunc_normal(mean=0, std=sigma, a=-3*sigma, b=3*sigma)
    freq = sigma * jax.random.truncated_normal(
        k_freq, -3.0, 3.0, (n_species, n_frequencies), dtype=jnp.float32)
    # _NLinear: uniform(-1/sqrt(2K), 1/sqrt(2K))
    d_in = 2 * n_frequencies
    bound = d_in ** (-0.5)
    w = jax.random.uniform(k_w, (n_species, d_in, d_token),
                           minval=-bound, maxval=bound, dtype=jnp.float32)
    b = jax.random.uniform(k_b, (n_species, d_token),
                           minval=-bound, maxval=bound, dtype=jnp.float32)
    return freq, w, b


def reference_forward(x, freq, w, bias):
    """Pure-JAX reference mirroring the PyTorch forward."""
    phase = 2.0 * math.pi * freq[None, :, :] * x[..., None]              # (B, S, K)
    feat = jnp.concatenate([jnp.cos(phase), jnp.sin(phase)], axis=-1)    # (B, S, 2K)
    out = jnp.einsum('bsk,skd->bsd', feat, w) + bias[None]               # (B, S, D)
    return jnp.maximum(out, 0.0)


if __name__ == "__main__":
    # Small, module-consistent shapes.
    B = 4            # batch
    N_SPECIES = 8
    D_TOKEN = 24
    N_FREQ = 48
    SIGMA = 0.01

    key = jax.random.PRNGKey(0)
    k_x, k_params = jax.random.split(key)
    x = jax.random.normal(k_x, (B, N_SPECIES), dtype=jnp.float32)
    freq, w, bias = init_params(k_params, N_SPECIES, D_TOKEN, N_FREQ, SIGMA)

    # Done once per model (init time), not per forward call.
    freq2pi_flat, w_bd, bias_flat = jax.block_until_ready(
        prepare_params(freq, w, bias))

    fwd = jax.jit(species_tokenizer_forward)
    out = fwd(x, freq2pi_flat, w_bd, bias_flat)
    out = jax.block_until_ready(out)

    ref = reference_forward(x, freq, w, bias)
    assert out.shape == (B, N_SPECIES, D_TOKEN)
    assert jnp.allclose(out, ref, atol=1e-5, rtol=1e-5), "mismatch vs reference"

    print("KERNEL_OK")
</pallas_src>

<mosaic_0001>
module attributes {stable_mosaic.version = 11 : i64} {
  func.func @_species_tokenizer_kernel(%arg0: memref<4x384xf32, #tpu.memory_space<vmem>>, %arg1: memref<1x384xf32, #tpu.memory_space<vmem>>, %arg2: memref<768x192xf32, #tpu.memory_space<vmem>>, %arg3: memref<1x192xf32, #tpu.memory_space<vmem>>, %arg4: memref<4x192xf32, #tpu.memory_space<vmem>>) attributes {dimension_semantics = [], scalar_prefetch = 0 : i64, scratch_operands = 0 : i64, tpu.core_type = #tpu.core_type<tc>} {
    %c0 = arith.constant 0 : index
    %c0_0 = arith.constant 0 : index
    %0 = vector.load %arg0[%c0, %c0_0] : memref<4x384xf32, #tpu.memory_space<vmem>>, vector<4x384xf32>
    %c0_1 = arith.constant 0 : index
    %c0_2 = arith.constant 0 : index
    %1 = vector.load %arg1[%c0_1, %c0_2] : memref<1x384xf32, #tpu.memory_space<vmem>>, vector<1x384xf32>
    %2 = vector.broadcast %1 : vector<1x384xf32> to vector<4x384xf32>
    %3 = arith.mulf %0, %2 : vector<4x384xf32>
    %4 = math.cos %3 : vector<4x384xf32>
    %5 = math.sin %3 : vector<4x384xf32>
    %6 = tpu.concatenate %4, %5 in 1 : vector<4x384xf32>, vector<4x384xf32> -> vector<4x768xf32>
    %c0_3 = arith.constant 0 : index
    %c0_4 = arith.constant 0 : index
    %7 = vector.load %arg2[%c0_3, %c0_4] : memref<768x192xf32, #tpu.memory_space<vmem>>, vector<768x192xf32>
    %cst = arith.constant dense<0.000000e+00> : vector<4x192xf32>
    %8 = tpu.matmul %6, %7, %cst {dimension_numbers = #tpu.dot_dimension_numbers<[1], [0], [0], [1], [0, 0, 1, 1], [], []>} : vector<4x768xf32>, vector<768x192xf32>, vector<4x192xf32> -> vector<4x192xf32>
    %c0_5 = arith.constant 0 : index
    %c0_6 = arith.constant 0 : index
    %9 = vector.load %arg3[%c0_5, %c0_6] : memref<1x192xf32, #tpu.memory_space<vmem>>, vector<1x192xf32>
    %10 = vector.broadcast %9 : vector<1x192xf32> to vector<4x192xf32>
    %11 = arith.addf %8, %10 : vector<4x192xf32>
    %cst_7 = arith.constant 0.000000e+00 : f32
    %12 = vector.broadcast %cst_7 : f32 to vector<4x192xf32>
    %13 = arith.maximumf %11, %12 : vector<4x192xf32>
    %c0_8 = arith.constant 0 : index
    %c0_9 = arith.constant 0 : index
    %14 = vector.load %arg4[%c0_8, %c0_9] : memref<4x192xf32, #tpu.memory_space<vmem>>, vector<4x192xf32>
    tpu.vector_store %arg4[%c0_8, %c0_9], %13 {strides = array<i32>} : memref<4x192xf32, #tpu.memory_space<vmem>>, vector<4x192xf32>,
    return
  }
}

</mosaic_0001>

<bundles_post_ra>
// kernel: species_tokenizer_forward.1
= control target key start
LH: loop header
LB: loop body
LE: loop exit
PB: predicated region body
PF: predicated region fallthrough
CT: control target
= control target key end

     0   :  { %vm26_vm0 = vcmask 1043456   ;;  %s1954_s2 = inlined_call_operand.vmem [shape: f32[768,192], index: 2, kind: input, shape index: {}]   ;;  %s1955_s1 = inlined_call_operand.vmem [shape: f32[1,384], index: 1, kind: input, shape index: {}]   ;;  %s1956_s0 = inlined_call_operand.vmem [shape: f32[4,384], index: 0, kind: input, shape index: {}]   ;;  %s1957_s3 = inlined_call_operand.vmem [shape: f32[1,192], index: 3, kind: input, shape index: {}]   ;;  %s1958_s4 = inlined_call_operand.vmem [shape: f32[4,192], index: 4, kind: output, shape index: {}]  }
   0x1   :  { %v765_v0 = vld [vmem:[%s1954_s2 + $0x2f0] sm:$0xff]  ;;  %v763_v2 = vld [vmem:[%s1954_s2 + $0x2e0] sm:$0xff]  ;;  %v702_v62 = vld [vmem:[%s1954_s2 + $0xf8] sm:$0xff] }
   0x2   :  { %v701_v1 = vld [vmem:[%s1954_s2 + $0xf0] sm:$0xff]  ;;  %909 = vmatpush.msra.mxu2 %v765_v0  ;;  %v699_v4 = vld [vmem:[%s1954_s2 + $0xe0] sm:$0xff] }
   0x3   :  { %869 = vmatpush.msra.mxu0 %v701_v1  ;;  %v797_v3 = vld [vmem:[%s1954_s2 + $0x3f0] sm:$0xff]  ;;  %v795_v7 = vld [vmem:[%s1954_s2 + $0x3e0] sm:$0xff]  ;;  %v734_v1 = vld [vmem:[%s1954_s2 + $0x1f8] sm:$0xff] }
   0x4   :  { %v733_v5 = vld [vmem:[%s1954_s2 + $0x1f0] sm:$0xff]  ;;  %929 = vmatpush.msra.mxu3 %v797_v3  ;;  %910 = vmatpush.msra.mxu2 %v763_v2  ;;  %v731_v9 = vld [vmem:[%s1954_s2 + $0x1e0] sm:$0xff]  ;;  %v700_v2 = vld [vmem:[%s1954_s2 + $0xe8] sm:$0xff] }
   0x5   :  { %889 = vmatpush.msra.mxu1 %v733_v5  ;;  %v761_v6 = vld [vmem:[%s1954_s2 + $0x2d0] sm:$0xff]  ;;  %870 = vmatpush.msra.mxu0 %v699_v4  ;;  %v759_v11 = vld [vmem:[%s1954_s2 + $0x2c0] sm:$0xff] }
   0x6   :  { %v697_v8 = vld [vmem:[%s1954_s2 + $0xd0] sm:$0xff]  ;;  %930 = vmatpush.msra.mxu3 %v795_v7  ;;  %v695_v12 = vld [vmem:[%s1954_s2 + $0xc0] sm:$0xff]  ;;  %911 = vmatpush.msra.mxu2 %v761_v6  ;;  %v698_v6 = vld [vmem:[%s1954_s2 + $0xd8] sm:$0xff] }
   0x7   :  { %v793_v10 = vld [vmem:[%s1954_s2 + $0x3d0] sm:$0xff]  ;;  %890 = vmatpush.msra.mxu1 %v731_v9  ;;  %871 = vmatpush.msra.mxu0 %v697_v8  ;;  %v791_v14 = vld [vmem:[%s1954_s2 + $0x3c0] sm:$0xff]  ;;  %v732_v7 = vld [vmem:[%s1954_s2 + $0x1e8] sm:$0xff] }
   0x8   :  { %v729_v13 = vld [vmem:[%s1954_s2 + $0x1d0] sm:$0xff]  ;;  %v727_v15 = vld [vmem:[%s1954_s2 + $0x1c0] sm:$0xff]  ;;  %931 = vmatpush.msra.mxu3 %v793_v10  ;;  %912 = vmatpush.msra.mxu2 %v759_v11  ;;  %v696_v10 = vld [vmem:[%s1954_s2 + $0xc8] sm:$0xff] }
   0x9   :  { %891 = vmatpush.msra.mxu1 %v729_v13  ;;  %v757_v16 = vld [vmem:[%s1954_s2 + $0x2b0] sm:$0xff]  ;;  %872 = vmatpush.msra.mxu0 %v695_v12  ;;  %v755_v20 = vld [vmem:[%s1954_s2 + $0x2a0] sm:$0xff]  ;;  %v730_v11 = vld [vmem:[%s1954_s2 + $0x1d8] sm:$0xff] }
   0xa   :  { %v693_v17 = vld [vmem:[%s1954_s2 + $0xb0] sm:$0xff]  ;;  %932 = vmatpush.msra.mxu3 %v791_v14  ;;  %v691_v21 = vld [vmem:[%s1954_s2 + $0xa0] sm:$0xff]  ;;  %913 = vmatpush.msra.mxu2 %v757_v16  ;;  %v694_v14 = vld [vmem:[%s1954_s2 + $0xb8] sm:$0xff] }
   0xb   :  { %v789_v18 = vld [vmem:[%s1954_s2 + $0x3b0] sm:$0xff]  ;;  %892 = vmatpush.msra.mxu1 %v727_v15  ;;  %873 = vmatpush.msra.mxu0 %v693_v17  ;;  %v787_v22 = vld [vmem:[%s1954_s2 + $0x3a0] sm:$0xff]  ;;  %v728_v15 = vld [vmem:[%s1954_s2 + $0x1c8] sm:$0xff] }
   0xc   :  { %v725_v19 = vld [vmem:[%s1954_s2 + $0x1b0] sm:$0xff]  ;;  %v723_v23 = vld [vmem:[%s1954_s2 + $0x1a0] sm:$0xff]  ;;  %933 = vmatpush.msra.mxu3 %v789_v18  ;;  %914 = vmatpush.msra.mxu2 %v755_v20  ;;  %v692_v18 = vld [vmem:[%s1954_s2 + $0xa8] sm:$0xff] }
   0xd   :  { %893 = vmatpush.msra.mxu1 %v725_v19  ;;  %v753_v24 = vld [vmem:[%s1954_s2 + $0x290] sm:$0xff]  ;;  %874 = vmatpush.msra.mxu0 %v691_v21  ;;  %v751_v28 = vld [vmem:[%s1954_s2 + $0x280] sm:$0xff]  ;;  %v726_v19 = vld [vmem:[%s1954_s2 + $0x1b8] sm:$0xff] }
   0xe   :  { %v689_v25 = vld [vmem:[%s1954_s2 + $0x90] sm:$0xff]  ;;  %934 = vmatpush.msra.mxu3 %v787_v22  ;;  %v687_v29 = vld [vmem:[%s1954_s2 + $0x80] sm:$0xff]  ;;  %915 = vmatpush.msra.mxu2 %v753_v24  ;;  %v690_v22 = vld [vmem:[%s1954_s2 + $0x98] sm:$0xff] }
   0xf   :  { %v785_v26 = vld [vmem:[%s1954_s2 + $0x390] sm:$0xff]  ;;  %894 = vmatpush.msra.mxu1 %v723_v23  ;;  %875 = vmatpush.msra.mxu0 %v689_v25  ;;  %v783_v30 = vld [vmem:[%s1954_s2 + $0x380] sm:$0xff]  ;;  %v724_v23 = vld [vmem:[%s1954_s2 + $0x1a8] sm:$0xff] }
  0x10   :  { %v721_v27 = vld [vmem:[%s1954_s2 + $0x190] sm:$0xff]  ;;  %v719_v31 = vld [vmem:[%s1954_s2 + $0x180] sm:$0xff]  ;;  %935 = vmatpush.msra.mxu3 %v785_v26  ;;  %916 = vmatpush.msra.mxu2 %v751_v28  ;;  %v18_v26 = vld [vmem:[%s1956_s0 + $0x8] sm:$0xf] }
  0x11   :  { %895 = vmatpush.msra.mxu1 %v721_v27  ;;  %v749_v32 = vld [vmem:[%s1954_s2 + $0x270] sm:$0xff]  ;;  %876 = vmatpush.msra.mxu0 %v687_v29  ;;  %v747_v36 = vld [vmem:[%s1954_s2 + $0x260] sm:$0xff]  ;;  %v688_v28 = vld [vmem:[%s1954_s2 + $0x88] sm:$0xff] }
  0x12   :  { %v685_v33 = vld [vmem:[%s1954_s2 + $0x70] sm:$0xff]  ;;  %936 = vmatpush.msra.mxu3 %v783_v30  ;;  %v683_v37 = vld [vmem:[%s1954_s2 + $0x60] sm:$0xff]  ;;  %917 = vmatpush.msra.mxu2 %v749_v32  ;;  %v722_v29 = vld [vmem:[%s1954_s2 + $0x198] sm:$0xff] }
  0x13   :  { %v781_v34 = vld [vmem:[%s1954_s2 + $0x370] sm:$0xff]  ;;  %896 = vmatpush.msra.mxu1 %v719_v31  ;;  %877 = vmatpush.msra.mxu0 %v685_v33  ;;  %v779_v38 = vld [vmem:[%s1954_s2 + $0x360] sm:$0xff] }
  0x14   :  { %v717_v35 = vld [vmem:[%s1954_s2 + $0x170] sm:$0xff]  ;;  %v715_v39 = vld [vmem:[%s1954_s2 + $0x160] sm:$0xff]  ;;  %937 = vmatpush.msra.mxu3 %v781_v34  ;;  %918 = vmatpush.msra.mxu2 %v747_v36  ;;  %v720_v36 = vld [vmem:[%s1954_s2 + $0x188] sm:$0xff] }
  0x15   :  { %897 = vmatpush.msra.mxu1 %v717_v35  ;;  %v745_v40 = vld [vmem:[%s1954_s2 + $0x250] sm:$0xff]  ;;  %878 = vmatpush.msra.mxu0 %v683_v37  ;;  %v743_v44 = vld [vmem:[%s1954_s2 + $0x240] sm:$0xff]  ;;  %v686_v35 = vld [vmem:[%s1954_s2 + $0x78] sm:$0xff] }
  0x16   :  { %v681_v41 = vld [vmem:[%s1954_s2 + $0x50] sm:$0xff]  ;;  %938 = vmatpush.msra.mxu3 %v779_v38  ;;  %v679_v45 = vld [vmem:[%s1954_s2 + $0x40] sm:$0xff]  ;;  %919 = vmatpush.msra.mxu2 %v745_v40 }
  0x17   :  { %v777_v42 = vld [vmem:[%s1954_s2 + $0x350] sm:$0xff]  ;;  %898 = vmatpush.msra.mxu1 %v715_v39  ;;  %879 = vmatpush.msra.mxu0 %v681_v41  ;;  %v775_v46 = vld [vmem:[%s1954_s2 + $0x340] sm:$0xff] }
  0x18   :  { %v713_v43 = vld [vmem:[%s1954_s2 + $0x150] sm:$0xff]  ;;  %v711_v47 = vld [vmem:[%s1954_s2 + $0x140] sm:$0xff]  ;;  %939 = vmatpush.msra.mxu3 %v777_v42  ;;  %920 = vmatpush.msra.mxu2 %v743_v44  ;;  %v684_v42 = vld [vmem:[%s1954_s2 + $0x68] sm:$0xff] }
  0x19   :  { %899 = vmatpush.msra.mxu1 %v713_v43  ;;  %v741_v48 = vld [vmem:[%s1954_s2 + $0x230] sm:$0xff]  ;;  %880 = vmatpush.msra.mxu0 %v679_v45  ;;  %v739_v52 = vld [vmem:[%s1954_s2 + $0x220] sm:$0xff]  ;;  %v718_v43 = vld [vmem:[%s1954_s2 + $0x178] sm:$0xff] }
  0x1a   :  { %v677_v49 = vld [vmem:[%s1954_s2 + $0x30] sm:$0xff]  ;;  %940 = vmatpush.msra.mxu3 %v775_v46  ;;  %v675_v53 = vld [vmem:[%s1954_s2 + $0x20] sm:$0xff]  ;;  %921 = vmatpush.msra.mxu2 %v741_v48 }
  0x1b   :  { %v773_v50 = vld [vmem:[%s1954_s2 + $0x330] sm:$0xff]  ;;  %900 = vmatpush.msra.mxu1 %v711_v47  ;;  %881 = vmatpush.msra.mxu0 %v677_v49  ;;  %v771_v54 = vld [vmem:[%s1954_s2 + $0x320] sm:$0xff] }
  0x1c   :  { %v709_v51 = vld [vmem:[%s1954_s2 + $0x130] sm:$0xff]  ;;  %v707_v55 = vld [vmem:[%s1954_s2 + $0x120] sm:$0xff]  ;;  %941 = vmatpush.msra.mxu3 %v773_v50  ;;  %922 = vmatpush.msra.mxu2 %v739_v52  ;;  %v682_v50 = vld [vmem:[%s1954_s2 + $0x58] sm:$0xff] }
  0x1d   :  { %901 = vmatpush.msra.mxu1 %v709_v51  ;;  %v737_v56 = vld [vmem:[%s1954_s2 + $0x210] sm:$0xff]  ;;  %882 = vmatpush.msra.mxu0 %v675_v53  ;;  %v735_v60 = vld [vmem:[%s1954_s2 + $0x200] sm:$0xff]  ;;  %v716_v51 = vld [vmem:[%s1954_s2 + $0x168] sm:$0xff] }
  0x1e   :  { %v673_v57 = vld [vmem:[%s1954_s2 + $0x10] sm:$0xff]  ;;  %942 = vmatpush.msra.mxu3 %v771_v54  ;;  %v671_v61 = vld [vmem:[%s1954_s2] sm:$0xff]  ;;  %923 = vmatpush.msra.mxu2 %v737_v56 }
  0x1f   :  { %v769_v58 = vld [vmem:[%s1954_s2 + $0x310] sm:$0xff]  ;;  %902 = vmatpush.msra.mxu1 %v707_v55  ;;  %883 = vmatpush.msra.mxu0 %v673_v57  ;;  %v767_v63 = vld [vmem:[%s1954_s2 + $0x300] sm:$0xff] }
  0x20   :  { %v705_v59 = vld [vmem:[%s1954_s2 + $0x110] sm:$0xff]  ;;  %943 = vmatpush.msra.mxu3 %v769_v58  ;;  %924 = vmatpush.msra.mxu2 %v735_v60  ;;  %v703_v3 = vld [vmem:[%s1954_s2 + $0x100] sm:$0xff]  ;;  %v680_v58 = vld [vmem:[%s1954_s2 + $0x48] sm:$0xff] }
  0x21   :  { %903 = vmatpush.msra.mxu1 %v705_v59  ;;  %v829_v0 = vld [vmem:[%s1954_s2 + $0x4f0] sm:$0xff]  ;;  %884 = vmatpush.msra.mxu0 %v671_v61  ;;  %v827_v4 = vld [vmem:[%s1954_s2 + $0x4e0] sm:$0xff]  ;;  %v714_v59 = vld [vmem:[%s1954_s2 + $0x158] sm:$0xff] }
  0x22   :  { %989 = vmatpush.msrb.mxu2 %v702_v62  ;;  %944 = vmatpush.msra.mxu3 %v767_v63  ;;  %v861_v5 = vld [vmem:[%s1954_s2 + $0x5f0] sm:$0xff]  ;;  %v859_v9 = vld [vmem:[%s1954_s2 + $0x5e0] sm:$0xff] }
  0x23   :  { %949 = vmatpush.msrb.mxu0 %v829_v0  ;;  %904 = vmatpush.msra.mxu1 %v703_v3  ;;  %v825_v8 = vld [vmem:[%s1954_s2 + $0x4d0] sm:$0xff]  ;;  %v823_v12 = vld [vmem:[%s1954_s2 + $0x4c0] sm:$0xff] }
  0x24   :  { %1009 = vmatpush.msrb.mxu3 %v734_v1  ;;  %990 = vmatpush.msrb.mxu2 %v700_v2  ;;  %v857_v13 = vld [vmem:[%s1954_s2 + $0x5d0] sm:$0xff]  ;;  %v855_v17 = vld [vmem:[%s1954_s2 + $0x5c0] sm:$0xff]  ;;  %v678_v1 = vld [vmem:[%s1954_s2 + $0x38] sm:$0xff] }
  0x25   :  { %950 = vmatpush.msrb.mxu0 %v827_v4  ;;  %969 = vmatpush.msrb.mxu1 %v861_v5  ;;  %v821_v16 = vld [vmem:[%s1954_s2 + $0x4b0] sm:$0xff]  ;;  %v819_v20 = vld [vmem:[%s1954_s2 + $0x4a0] sm:$0xff]  ;;  %v712_v2 = vld [vmem:[%s1954_s2 + $0x148] sm:$0xff] }
  0x26   :  { %991 = vmatpush.msrb.mxu2 %v698_v6  ;;  %1010 = vmatpush.msrb.mxu3 %v732_v7  ;;  %v853_v21 = vld [vmem:[%s1954_s2 + $0x5b0] sm:$0xff]  ;;  %v851_v25 = vld [vmem:[%s1954_s2 + $0x5a0] sm:$0xff] }
  0x27   :  { %951 = vmatpush.msrb.mxu0 %v825_v8  ;;  %970 = vmatpush.msrb.mxu1 %v859_v9  ;;  %v817_v24 = vld [vmem:[%s1954_s2 + $0x490] sm:$0xff]  ;;  %v19_v27 = vld [vmem:[%s1955_s1] sm:$0x7]  ;;  %v676_v8 = vld [vmem:[%s1954_s2 + $0x28] sm:$0xff] }
  0x28   :  { %992 = vmatpush.msrb.mxu2 %v696_v10  ;;  %1011 = vmatpush.msrb.mxu3 %v730_v11  ;;  %v21_v30 = vperm.slane %v19_v27, 0  ;;  %v22_v31 = vperm.slane %v19_v27, 1  ;;  %v23_v32 = vperm.slane %v19_v27, 2  ;;  %v815_v33 = vld [vmem:[%s1954_s2 + $0x480] sm:$0xff]  ;;  %v849_v34 = vld [vmem:[%s1954_s2 + $0x590] sm:$0xff]  ;;  %v710_v9 = vld [vmem:[%s1954_s2 + $0x138] sm:$0xff] }
  0x29   :  { %952 = vmatpush.msrb.mxu0 %v823_v12  ;;  %971 = vmatpush.msrb.mxu1 %v857_v13  ;;  %v17_v37 = vld [vmem:[%s1956_s0] sm:$0xff]  ;;  %v813_v40 = vld [vmem:[%s1954_s2 + $0x470] sm:$0xff]  ;;  %v1143_v27 = vmov 2475754826  }
  0x2a   :  { %993 = vmatpush.msrb.mxu2 %v694_v14  ;;  %1012 = vmatpush.msrb.mxu3 %v728_v15  ;;  %v25_v38 = vrot.slane %v22_v31, 4  ;;  %v1471_v39 = vmul.f32 %v23_v32, %v18_v26  ;;  %v847_v41 = vld [vmem:[%s1954_s2 + $0x580] sm:$0xff]  ;;  %v845_v48 = vld [vmem:[%s1954_s2 + $0x570] sm:$0xff]  ;;  %v674_v15 = vld [vmem:[%s1954_s2 + $0x18] sm:$0xff]  ;;  %v1145_v32 = vmov 2102212464  }
  0x2b   :  { %953 = vmatpush.msrb.mxu0 %v821_v16  ;;  %972 = vmatpush.msrb.mxu1 %v855_v17  ;;  %v811_v47 = vld [vmem:[%s1954_s2 + $0x460] sm:$0xff]  ;;  %v809_v54 = vld [vmem:[%s1954_s2 + $0x450] sm:$0xff]  ;;  %v708_v16 = vld [vmem:[%s1954_s2 + $0x128] sm:$0xff] }
  0x2c   :  { %994 = vmatpush.msrb.mxu2 %v692_v18  ;;  %1013 = vmatpush.msrb.mxu3 %v726_v19  ;;  %v185_v44 = vand.u32 2147483647, %v1471_v39  ;;  %v188_v45 = vand.u32 2139095040, %v1471_v39  ;;  %v27_v46 = vsel %vm26_vm0, %v21_v30, %v25_v38  ;;  %v843_v55 = vld [vmem:[%s1954_s2 + $0x560] sm:$0xff]  ;;  %v841_v63 = vld [vmem:[%s1954_s2 + $0x550] sm:$0xff] }
  0x2d   :  { %954 = vmatpush.msrb.mxu0 %v819_v20  ;;  %973 = vmatpush.msrb.mxu1 %v853_v21  ;;  %v1494_v49 = vmul.f32 %v27_v46, %v17_v37  ;;  %v807_v62 = vld [vmem:[%s1954_s2 + $0x440] sm:$0xff]  ;;  %v805_v4 = vld [vmem:[%s1954_s2 + $0x430] sm:$0xff]  ;;  %v1144_v30 = vmov 2131351028  }
  0x2e   :  { %995 = vmatpush.msrb.mxu2 %v690_v22  ;;  %1014 = vmatpush.msrb.mxu3 %v724_v23  ;;  %v189_v52 = vshrl.u32 %v188_v45, 23  ;;  %v192_v53 = vand.u32 8388607, %v185_v44  ;;  %v839_v5 = vld [vmem:[%s1954_s2 + $0x540] sm:$0xff]  ;;  %v837_v12 = vld [vmem:[%s1954_s2 + $0x530] sm:$0xff]  ;;  %v672_v22 = vld [vmem:[%s1954_s2 + $0x8] sm:$0xff] }
  0x2f   :  { %955 = vmatpush.msrb.mxu0 %v817_v24  ;;  %974 = vmatpush.msrb.mxu1 %v851_v25  ;;  %v31_v56 = vand.u32 2147483647, %v1494_v49  ;;  %v34_v57 = vand.u32 2139095040, %v1494_v49  ;;  %v803_v11 = vld [vmem:[%s1954_s2 + $0x420] sm:$0xff]  ;;  %v801_v18 = vld [vmem:[%s1954_s2 + $0x410] sm:$0xff]  ;;  %v706_v23 = vld [vmem:[%s1954_s2 + $0x118] sm:$0xff] }
  0x30   :  { %996 = vmatpush.msrb.mxu2 %v688_v28  ;;  %1015 = vmatpush.msrb.mxu3 %v722_v29  ;;  %v1126_v60 = vadd.s32 4294967169, %v189_v52  ;;  %v193_v61 = vor.u32 8388608, %v192_v53  ;;  %v835_v19 = vld [vmem:[%s1954_s2 + $0x520] sm:$0xff]  ;;  %v1142_v25 = vmov 683565275  }
  0x31   :  { %956 = vmatpush.msrb.mxu0 %v815_v33  ;;  %975 = vmatpush.msrb.mxu1 %v849_v34  ;;  %v35_v0 = vshrl.u32 %v34_v57, 23  ;;  %v1538_v7 = vand.u32 8388607, %v31_v56  ;;  %v1146_v34 = vmov 920167782  }
  0x32   :  { %997 = vmatpush.msrb.mxu2 %v686_v35  ;;  %1016 = vmatpush.msrb.mxu3 %v720_v36  ;;  %v195_v3 = vadd.s32 1, %v1126_v60  ;;  %v1546_v10 = vshll.u32 %v193_v61, 8 }
  0x33   :  { %957 = vmatpush.msrb.mxu0 %v813_v40  ;;  %976 = vmatpush.msrb.mxu1 %v847_v41  ;;  %v1123_v6 = vadd.s32 4294967169, %v35_v0  ;;  %v39_v21 = vor.u32 8388608, %v1538_v7 }
  0x34   :  { %998 = vmatpush.msrb.mxu2 %v684_v42  ;;  %1017 = vmatpush.msrb.mxu3 %v718_v43  ;;  %vm196_vm1 = vcmp.gt.s32.totalorder %v195_v3, 0  ;;  %v234_v29 = vand.u32 65535, %v1546_v10  ;;  %v235_v40 = vshrl.u32 %v1546_v10, 16  ;;  %v1147_v43 = vmov 1326507024  }
  0x35   :  { %958 = vmatpush.msrb.mxu0 %v811_v47  ;;  %977 = vmatpush.msrb.mxu1 %v845_v48  ;;  %v197_v13 = vsel %vm196_vm1, %v195_v3, 0  ;;  %v41_v14 = vadd.s32 1, %v1123_v6  ;;  %v1597_v3 = vshll.u32 %v39_v21, 8 }
  0x36   :  { %999 = vmatpush.msrb.mxu2 %v682_v50  ;;  %1018 = vmatpush.msrb.mxu3 %v716_v51  ;;  %v199_v17 = vand.u32 31, %v197_v13  ;;  %v1566_v20 = vshrl.u32 %v197_v13, 5 }
  0x37   :  { %959 = vmatpush.msrb.mxu0 %v809_v54  ;;  %978 = vmatpush.msrb.mxu1 %v843_v55  ;;  %vm42_vm2 = vcmp.gt.s32.totalorder %v41_v14, 0 }
  0x38   :  { %1000 = vmatpush.msrb.mxu2 %v680_v58  ;;  %1019 = vmatpush.msrb.mxu3 %v714_v59  ;;  %v200_v24 = vsub.s32 32, %v199_v17  ;;  %v202_v26 = vshll.u32 %v1142_v25, %v199_v17  ;;  %v205_v28 = vshll.u32 %v1143_v27, %v199_v17  ;;  %v208_v31 = vshll.u32 %v1144_v30, %v199_v17 }
  0x39   :  { %960 = vmatpush.msrb.mxu0 %v807_v62  ;;  %979 = vmatpush.msrb.mxu1 %v841_v63  ;;  %v211_v33 = vshll.u32 %v1145_v32, %v199_v17  ;;  %v214_v35 = vshll.u32 %v1146_v34, %v199_v17  ;;  %vm217_vm3 = vcmp.lt.s32.totalorder %v1566_v20, 1  ;;  %vm220_vm4 = vcmp.lt.s32.totalorder %v1566_v20, 4 }
  0x3a   :  { %1001 = vmatpush.msrb.mxu2 %v678_v1  ;;  %1020 = vmatpush.msrb.mxu3 %v712_v2  ;;  %v201_v36 = vshrl.u32 %v1142_v25, %v200_v24  ;;  %v203_v37 = vshrl.u32 %v1143_v27, %v200_v24  ;;  %v206_v38 = vshrl.u32 %v1144_v30, %v200_v24  ;;  %v43_v48 = vsel %vm42_vm2, %v41_v14, 0 }
  0x3b   :  { %961 = vmatpush.msrb.mxu0 %v805_v4  ;;  %980 = vmatpush.msrb.mxu1 %v839_v5  ;;  %v209_v41 = vshrl.u32 %v1145_v32, %v200_v24  ;;  %v212_v42 = vshrl.u32 %v1146_v34, %v200_v24  ;;  %v215_v45 = vshrl.u32 %v1147_v43, %v200_v24  ;;  %vm219_vm5 = vcmp.lt.s32.totalorder %v1566_v20, 3 }
  0x3c   :  { %1002 = vmatpush.msrb.mxu2 %v676_v8  ;;  %1021 = vmatpush.msrb.mxu3 %v710_v9  ;;  %v204_v46 = vor.u32 %v203_v37, %v202_v26  ;;  %v207_v47 = vor.u32 %v206_v38, %v205_v28  ;;  %vm218_vm6 = vcmp.lt.s32.totalorder %v1566_v20, 2  ;;  %v45_v55 = vand.u32 31, %v43_v48 }
  0x3d   :  { %962 = vmatpush.msrb.mxu0 %v803_v11  ;;  %981 = vmatpush.msrb.mxu1 %v837_v12  ;;  %v210_v50 = vor.u32 %v209_v41, %v208_v31  ;;  %v213_v51 = vor.u32 %v212_v42, %v211_v33  ;;  %v216_v52 = vor.u32 %v215_v45, %v214_v35  ;;  %v1603_v9 = vshrl.u32 %v43_v48, 5 }
  0x3e   :  { %1003 = vmatpush.msrb.mxu2 %v674_v15  ;;  %1022 = vmatpush.msrb.mxu3 %v708_v16  ;;  %v221_v53 = vsel %vm217_vm3, %v201_v36, %v204_v46  ;;  %v225_v54 = vsel %vm217_vm3, %v204_v46, %v207_v47  ;;  %v1591_v0 = vsub.s32 32, %v45_v55  ;;  %v48_v11 = vshll.u32 %v1142_v25, %v45_v55 }
  0x3f   :  { %963 = vmatpush.msrb.mxu0 %v801_v18  ;;  %982 = vmatpush.msrb.mxu1 %v835_v19  ;;  %v222_v57 = vsel %vm220_vm4, %v210_v50, 2102212464  ;;  %v226_v58 = vsel %vm220_vm4, %v213_v51, 920167782  ;;  %v229_v59 = vsel %vm217_vm3, %v207_v47, %v210_v50  ;;  %v230_v60 = vsel %vm220_vm4, %v216_v52, 1326507024 }
  0x40   :  { %1004 = vmatpush.msrb.mxu2 %v672_v22  ;;  %1023 = vmatpush.msrb.mxu3 %v706_v23  ;;  %v223_v61 = vsel %vm219_vm5, %v207_v47, %v222_v57  ;;  %v227_v62 = vsel %vm219_vm5, %v210_v50, %v226_v58  ;;  %v231_v63 = vsel %vm219_vm5, %v213_v51, %v230_v60  ;;  %v1148_v38 = vmov 0  }
  0x41   :  { %v228_v1 = vsel %vm218_vm6, %v225_v54, %v227_v62  ;;  %v232_v2 = vsel %vm218_vm6, %v229_v59, %v231_v63  ;;  %v1601_v8 = vsel %vm218_vm6, %v221_v53, %v223_v61  ;;  %v49_v12 = vshrl.u32 %v1143_v27, %v1591_v0 }
  0x42   :  { %v236_v4 = vand.u32 65535, %v232_v2  ;;  %v237_v5 = vshrl.u32 %v232_v2, 16  ;;  %v258_v6 = vand.u32 65535, %v228_v1  ;;  %v259_v7 = vshrl.u32 %v228_v1, 16 }
  0x43   :  { %v51_v16 = vshll.u32 %v1143_v27, %v45_v55  ;;  %v52_v37 = vshrl.u32 %v1144_v30, %v1591_v0  ;;  %v1610_v41 = vor.u32 %v49_v12, %v48_v11  ;;  %v54_v45 = vshll.u32 %v1144_v30, %v45_v55 }
  0x44   :  { %v238_v13 = vmul.u32 %v236_v4, %v234_v29  ;;  %v239_v14 = vmul.u32 %v237_v5, %v234_v29  ;;  %v240_v15 = vmul.u32 %v236_v4, %v235_v40  ;;  %v241_v17 = vmul.u32 %v237_v5, %v235_v40 }
  0x45   :  { %v260_v18 = vmul.u32 %v258_v6, %v234_v29  ;;  %v261_v19 = vmul.u32 %v259_v7, %v234_v29  ;;  %v262_v21 = vmul.u32 %v258_v6, %v235_v40  ;;  %v263_v20 = vmul.u32 %v259_v7, %v235_v40 }
  0x46   :  { %v242_v22 = vshll.u32 %v239_v14, 16  ;;  %v243_v23 = vshrl.u32 %v239_v14, 16  ;;  %v244_v24 = vshll.u32 %v240_v15, 16  ;;  %v245_v26 = vshrl.u32 %v240_v15, 16 }
  0x47   :  { %v264_v28 = vshll.u32 %v261_v19, 16  ;;  %v265_v31 = vshrl.u32 %v261_v19, 16  ;;  %v266_v33 = vshll.u32 %v262_v21, 16  ;;  %v267_v36 = vshrl.u32 %v262_v21, 16 }
  0x48   :  { %vm246_vm7 = vc.u32 %v238_v13, %v242_v22  ;;  %v248_v35 = vadd.s32 %v242_v22, %v238_v13  ;;  %v1615_v48 = vor.u32 %v52_v37, %v51_v16  ;;  %v55_v52 = vshrl.u32 %v1145_v32, %v1591_v0 }
  0x49   :  { %v247_v27 = vsel %vm246_vm7, 1, %v1148_v38  ;;  %vm268_vm8 = vc.u32 %v260_v18, %v264_v28  ;;  %v270_v29 = vadd.s32 %v264_v28, %v260_v18  ;;  %v57_v53 = vshll.u32 %v1145_v32, %v45_v55 }
  0x4a   :  { %v249_v42 = vadd.s32 %v247_v27, %v241_v17  ;;  %vm250_vm9 = vc.u32 %v248_v35, %v244_v24  ;;  %v269_v40 = vsel %vm268_vm8, 1, %v1148_v38  ;;  %v58_v57 = vshrl.u32 %v1146_v34, %v1591_v0 }
  0x4b   :  { %v251_v46 = vsel %vm250_vm9, 1, %v1148_v38  ;;  %v271_v47 = vadd.s32 %v269_v40, %v263_v20  ;;  %vm272_vm10 = vc.u32 %v270_v29, %v266_v33  ;;  %v60_v30 = vshll.u32 %v1146_v34, %v45_v55 }
  0x4c   :  { %v253_v50 = vadd.s32 %v251_v46, %v249_v42  ;;  %v273_v51 = vsel %vm272_vm10, 1, %v1148_v38  ;;  %v61_v58 = vshrl.u32 %v1147_v43, %v1591_v0  ;;  %v1626_v60 = vadd.s32 %v270_v29, %v266_v33 }
  0x4d   :  { %v275_v54 = vadd.s32 %v273_v51, %v271_v47  ;;  %v56_v61 = vor.u32 %v55_v52, %v54_v45  ;;  %vm63_vm11 = vcmp.lt.s32.totalorder %v1603_v9, 1  ;;  %v59_v63 = vor.u32 %v58_v57, %v57_v53 }
  0x4e   :  { %v254_v59 = vadd.s32 %v253_v50, %v243_v23  ;;  %v62_v1 = vor.u32 %v61_v58, %v60_v30  ;;  %vm65_vm12 = vcmp.lt.s32.totalorder %v1603_v9, 3  ;;  %vm64_vm13 = vcmp.lt.s32.totalorder %v1603_v9, 2 }
  0x4f   :  { %v276_v62 = vadd.s32 %v275_v54, %v265_v31  ;;  %vm66_vm14 = vcmp.lt.s32.totalorder %v1603_v9, 4  ;;  %v71_v34 = vsel %vm63_vm11, %v1610_v41, %v1615_v48  ;;  %v80_v2 = vand.u32 65535, %v1597_v3 }
  0x50   :  { %v1630_v32 = vadd.s32 %v254_v59, %v245_v26  ;;  %v72_v55 = vsel %vm66_vm14, %v59_v63, 920167782  ;;  %v278_v4 = vmul.u32 %v1546_v10, %v1601_v8  ;;  %v75_v6 = vsel %vm63_vm11, %v1615_v48, %v56_v61 }
  0x51   :  { %v277_v43 = vadd.s32 %v276_v62, %v267_v36  ;;  %v73_v5 = vsel %vm65_vm12, %v56_v61, %v72_v55  ;;  %v76_v12 = vsel %vm66_vm14, %v62_v1, 1326507024  ;;  %v81_v13 = vshrl.u32 %v1597_v3, 16 }
  0x52   :  { %vm280_vm15 = vc.u32 %v1630_v32, %v1626_v60  ;;  %v74_v11 = vsel %vm64_vm13, %v71_v34, %v73_v5  ;;  %v77_v10 = vsel %vm65_vm12, %v59_v63, %v76_v12  ;;  %v47_v35 = vshrl.u32 %v1142_v25, %v1591_v0 }
  0x53   :  { %v281_v7 = vadd.s32 1, %v277_v43  ;;  %v104_v8 = vand.u32 65535, %v74_v11  ;;  %v105_v14 = vshrl.u32 %v74_v11, 16  ;;  %v78_v16 = vsel %vm64_vm13, %v75_v6, %v77_v10 }
  0x54   :  { %v82_v18 = vand.u32 65535, %v78_v16  ;;  %v83_v19 = vshrl.u32 %v78_v16, 16  ;;  %v68_v45 = vsel %vm66_vm14, %v56_v61, 2102212464  ;;  %v67_v62 = vsel %vm63_vm11, %v47_v35, %v1610_v41 }
  0x55   :  { %v282_v15 = vsel %vm280_vm15, %v281_v7, %v277_v43  ;;  %v106_v21 = vmul.u32 %v104_v8, %v80_v2  ;;  %v107_v22 = vmul.u32 %v105_v14, %v80_v2  ;;  %v108_v23 = vmul.u32 %v104_v8, %v81_v13 }
  0x56   :  { %v283_v17 = vadd.s32 %v282_v15, %v278_v4  ;;  %v84_v20 = vmul.u32 %v82_v18, %v80_v2  ;;  %v85_v26 = vmul.u32 %v83_v19, %v80_v2  ;;  %v86_v28 = vmul.u32 %v82_v18, %v81_v13 }
  0x57   :  { %v110_v31 = vshll.u32 %v107_v22, 16  ;;  %v87_v36 = vmul.u32 %v83_v19, %v81_v13  ;;  %v109_v29 = vmul.u32 %v105_v14, %v81_v13  ;;  %v112_v42 = vshll.u32 %v108_v23, 16 }
  0x58   :  { %v284_v24 = vadd.s32 536870912, %v283_v17  ;;  %v88_v37 = vshll.u32 %v85_v26, 16  ;;  %v90_v27 = vshll.u32 %v86_v28, 16  ;;  %v111_v50 = vshrl.u32 %v107_v22, 16 }
  0x59   :  { %vm114_vm1 = vc.u32 %v106_v21, %v110_v31  ;;  %v116_v52 = vadd.s32 %v110_v31, %v106_v21  ;;  %v89_v0 = vshrl.u32 %v85_v26, 16  ;;  %v91_v54 = vshrl.u32 %v86_v28, 16 }
  0x5a   :  { %v1659_v33 = vshrl.u32 %v284_v24, 30  ;;  %vm92_vm2 = vc.u32 %v84_v20, %v88_v37  ;;  %v94_v46 = vadd.s32 %v88_v37, %v84_v20  ;;  %v115_v51 = vsel %vm114_vm1, 1, %v1148_v38  ;;  %v799_v37 = vld [vmem:[%s1954_s2 + $0x400] sm:$0xff] }
  0x5b   :  { %v93_v47 = vsel %vm92_vm2, 1, %v1148_v38  ;;  %v117_v30 = vadd.s32 %v115_v51, %v109_v29  ;;  %vm118_vm4 = vc.u32 %v116_v52, %v112_v42  ;;  %v69_v63 = vsel %vm65_vm12, %v1615_v48, %v68_v45  ;;  %964 = vmatpush.msrb.mxu0 %v799_v37 }
  0x5c   :  { %v286_v40 = vshll.u32 %v1659_v33, 30  ;;  %v95_v53 = vadd.s32 %v93_v47, %v87_v36  ;;  %vm96_vm3 = vc.u32 %v94_v46, %v90_v27  ;;  %v119_v61 = vsel %vm118_vm4, 1, %v1148_v38  ;;  %v833_v27 = vld [vmem:[%s1954_s2 + $0x510] sm:$0xff] }
  0x5d   :  { %v97_v57 = vsel %vm96_vm3, 1, %v1148_v38  ;;  %v113_v1 = vshrl.u32 %v108_v23, 16  ;;  %v121_v34 = vadd.s32 %v119_v61, %v117_v30  ;;  %v120_v4 = vadd.s32 %v116_v52, %v112_v42  ;;  %983 = vmatpush.msrb.mxu1 %v833_v27 }
  0x5e   :  { %v287_v25 = vsub.s32 %v283_v17, %v286_v40  ;;  %v99_v59 = vadd.s32 %v97_v57, %v95_v53  ;;  %v70_v6 = vsel %vm64_vm13, %v67_v62, %v69_v63  ;;  %v279_v41 = vadd.s32 %v1626_v60, %v1630_v32 }
  0x5f   :  { %v122_v5 = vadd.s32 %v121_v34, %v111_v50  ;;  %v124_v12 = vmul.u32 %v1597_v3, %v70_v6  ;;  %vm187_vm8 = vcmp.lt.s32.totalorder %v1471_v39, 0  ;;  %vm1687_vm9 = vcmp.le.f32.partialorder %v185_v44, 0.7853982  ;;  %v704_v44 = vld [vmem:[%s1954_s2 + $0x108] sm:$0xff] }
  0x60   :  { %vm288_vm5 = vcmp.lt.s32.totalorder %v287_v25, 0  ;;  %v289_v58 = vsub.s32 0, %v287_v25  ;;  %v100_v55 = vadd.s32 %v99_v59, %v89_v0  ;;  %v309_v36 = vsub.s32 4, %v1659_v33  ;;  %1024 = vmatpush.msrb.mxu3 %v704_v44 }
  0x61   :  { %v123_v11 = vadd.s32 %v122_v5, %v113_v1  ;;  %vm328_vm15 = vweird.f32 %v1471_v39  ;;  %vm33_vm3 = vcmp.lt.s32.totalorder %v1494_v49, 0  ;;  %vm1715_vm4 = vcmp.le.f32.partialorder %v31_v56, 0.7853982 }
  0x62   :  { %v290_v43 = vsel %vm288_vm5, %v289_v58, %v287_v25  ;;  %v101_v7 = vadd.s32 %v100_v55, %v91_v54  ;;  %v310_v46 = vsel %vm187_vm8, %v309_v36, %v1659_v33 }
  0x63   :  { %v291_v2 = vclz %v290_v43  ;;  %v127_v48 = vadd.s32 1, %v123_v11  ;;  %v312_v53 = vsel %vm1687_vm9, 0, %v310_v46 }
  0x64   :  { %vm126_vm7 = vc.u32 %v101_v7, %v120_v4  ;;  %v125_v0 = vadd.s32 %v120_v4, %v101_v7  ;;  %v329_v33 = vand.u32 3, %v312_v53  ;;  %v638_v34 = vadd.s32 3, %v312_v53  ;;  %v822_v53 = vld [vmem:[%s1954_s2 + $0x4b8] sm:$0xff] }
  0x65   :  { %v1127_v38 = vadd.s32 4294967294, %v291_v2  ;;  %v128_v15 = vsel %vm126_vm7, %v127_v48, %v123_v11 }
  0x66   :  { %v129_v9 = vadd.s32 %v128_v15, %v124_v12  ;;  %vm334_vm12 = vcmp.eq.s32.totalorder %v329_v33, 2  ;;  %vm331_vm13 = vcmp.eq.s32.totalorder %v329_v33, 0  ;;  %vm330_vm14 = vcmp.lt.s32.totalorder %v329_v33, 2 }
  0x67   :  { %vm1128_vm6 = vcmp.lt.s32.totalorder %v1127_v38, 0 }
  0x68   :  { %v294_v13 = vsel %vm1128_vm6, 0, %v1127_v38  ;;  %v130_v21 = vadd.s32 536870912, %v129_v9  ;;  %v639_v38 = vand.u32 3, %v638_v34 }
  0x69   :  { %v295_v10 = vsub.s32 32, %v294_v13  ;;  %v296_v8 = vshll.u32 %v287_v25, %v294_v13  ;;  %v299_v14 = vsub.s32 4294967266, %v294_v13 }
  0x6a   :  { %v1681_v24 = vshrl.u32 %v130_v21, 30  ;;  %vm641_vm1 = vcmp.eq.s32.totalorder %v639_v38, 0  ;;  %vm644_vm2 = vcmp.eq.s32.totalorder %v639_v38, 2  ;;  %vm640_vm5 = vcmp.lt.s32.totalorder %v639_v38, 2  ;;  %v766_v38 = vld [vmem:[%s1954_s2 + $0x2f8] sm:$0xff] }
  0x6b   :  { %v297_v16 = vshrl.u32 %v279_v41, %v295_v10  ;;  %v300_v17 = vadd.s32 127, %v299_v14 }
  0x6c   :  { %v132_v3 = vshll.u32 %v1681_v24, 30 }
  0x6d   :  { %v298_v18 = vor.u32 %v297_v16, %v296_v8  ;;  %v301_v19 = vshll.u32 %v300_v17, 23  ;;  %v862_v17 = vld [vmem:[%s1954_s2 + $0x5f8] sm:$0xff] }
  0x6e   :  { %v133_v20 = vsub.s32 %v129_v9, %v132_v3 }
  0x6f   :  { %v302_v22 = vor.u32 4788187, %v301_v19  ;;  %v305_v23 = vcvt.s32.f32 %v298_v18 }
  0x70   :  { %vm134_vm10 = vcmp.lt.s32.totalorder %v133_v20, 0  ;;  %v135_v31 = vsub.s32 0, %v133_v20 }
  0x71   :  { %v303_v60 = vand.u32 2147483647, %v302_v22 }
  0x72   :  { %v136_v42 = vsel %vm134_vm10, %v135_v31, %v133_v20  ;;  %v830_v31 = vld [vmem:[%s1954_s2 + $0x4f8] sm:$0xff] }
  0x73   :  { %v306_v32 = vmul.f32 %v305_v23, %v303_v60  ;;  %v137_v45 = vclz %v136_v42  ;;  %v155_v23 = vsub.s32 4, %v1681_v24 }
  0x75   :  { %v307_v28 = vxor.u32 2147483648, %v306_v32  ;;  %v1124_v51 = vadd.s32 4294967294, %v137_v45  ;;  %v826_v45 = vld [vmem:[%s1954_s2 + $0x4d8] sm:$0xff] }
  0x77   :  { %v308_v35 = vsel %vm187_vm8, %v307_v28, %v306_v32  ;;  %vm1125_vm11 = vcmp.lt.s32.totalorder %v1124_v51, 0  ;;  %v156_v28 = vsel %vm33_vm3, %v155_v23, %v1681_v24  ;;  %v828_v24 = vld [vmem:[%s1954_s2 + $0x4e8] sm:$0xff] }
  0x78   :  { %v311_v29 = vsel %vm1687_vm9, %v1471_v39, %v308_v35  ;;  %v140_v54 = vsel %vm1125_vm11, 0, %v1124_v51  ;;  %v158_v27 = vsel %vm1715_vm4, 0, %v156_v28  ;;  %vm174_vm9 = vweird.f32 %v1494_v49  ;;  %v860_v23 = vld [vmem:[%s1954_s2 + $0x5e8] sm:$0xff] }
  0x79   :  { %v313_v40 = vmul.f32 %v311_v29, %v311_v29  ;;  %v141_v58 = vsub.s32 32, %v140_v54  ;;  %v142_v59 = vshll.u32 %v133_v20, %v140_v54  ;;  %v145_v61 = vsub.s32 4294967266, %v140_v54  ;;  %v800_v28 = vld [vmem:[%s1954_s2 + $0x408] sm:$0xff] }
  0x7a   :  { %v175_v46 = vand.u32 3, %v158_v27 }
  0x7b   :  { %v314_v47 = vmul.f32 -0.001358992, %v313_v40  ;;  %v321_v50 = vmul.f32 -0.00019511016, %v313_v40  ;;  %v143_v1 = vshrl.u32 %v125_v0, %v141_v58  ;;  %v146_v43 = vadd.s32 127, %v145_v61  ;;  %v820_v58 = vld [vmem:[%s1954_s2 + $0x4a8] sm:$0xff] }
  0x7c   :  { %vm180_vm6 = vcmp.eq.s32.totalorder %v175_v46, 2  ;;  %vm177_vm7 = vcmp.eq.s32.totalorder %v175_v46, 0  ;;  %vm176_vm8 = vcmp.lt.s32.totalorder %v175_v46, 2  ;;  %v780_v46 = vld [vmem:[%s1954_s2 + $0x368] sm:$0xff] }
  0x7d   :  { %v315_v52 = vadd.f32 0.041655596, %v314_v47  ;;  %v322_v25 = vadd.f32 0.008332121, %v321_v50  ;;  %v144_v5 = vor.u32 %v143_v1, %v142_v59  ;;  %v147_v4 = vshll.u32 %v146_v43, 23  ;;  %v816_v1 = vld [vmem:[%s1954_s2 + $0x488] sm:$0xff] }
  0x7e   :  { %v483_v47 = vadd.s32 3, %v158_v27  ;;  %v854_v27 = vld [vmem:[%s1954_s2 + $0x5b8] sm:$0xff] }
  0x7f   :  { %v316_v57 = vmul.f32 %v315_v52, %v313_v40  ;;  %v323_v30 = vmul.f32 %v322_v25, %v313_v40  ;;  %v148_v11 = vor.u32 4788187, %v147_v4  ;;  %v151_v41 = vcvt.s32.f32 %v144_v5  ;;  %v824_v52 = vld [vmem:[%s1954_s2 + $0x4c8] sm:$0xff] }
  0x80   :  { %v484_v54 = vand.u32 3, %v483_v47  ;;  %v812_v5 = vld [vmem:[%s1954_s2 + $0x468] sm:$0xff] }
  0x81   :  { %v317_v62 = vadd.f32 -0.4999988, %v316_v57  ;;  %v324_v63 = vadd.f32 -0.16666654, %v323_v30  ;;  %v149_v13 = vand.u32 2147483647, %v148_v11 }
  0x82   :  { %vm486_vm10 = vcmp.eq.s32.totalorder %v484_v54, 0  ;;  %vm489_vm11 = vcmp.eq.s32.totalorder %v484_v54, 2  ;;  %v798_v11 = vld [vmem:[%s1954_s2 + $0x3f8] sm:$0xff]  ;;  %v848_v47 = vld [vmem:[%s1954_s2 + $0x588] sm:$0xff] }
  0x83   :  { %v318_v55 = vmul.f32 %v317_v62, %v313_v40  ;;  %v325_v2 = vmul.f32 %v324_v63, %v313_v40  ;;  %v152_v14 = vmul.f32 %v151_v41, %v149_v13  ;;  %v818_v62 = vld [vmem:[%s1954_s2 + $0x498] sm:$0xff]  ;;  %v808_v41 = vld [vmem:[%s1954_s2 + $0x448] sm:$0xff] }
  0x84   :  { %v796_v13 = vld [vmem:[%s1954_s2 + $0x3e8] sm:$0xff] }
  0x85   :  { %v319_v6 = vadd.f32 1.0, %v318_v55  ;;  %v326_v7 = vadd.f32 1.0, %v325_v2  ;;  %v153_v9 = vxor.u32 2147483648, %v152_v14  ;;  %v814_v2 = vld [vmem:[%s1954_s2 + $0x478] sm:$0xff] }
  0x87   :  { %v327_v12 = vmul.f32 %v326_v7, %v311_v29  ;;  %v335_v48 = vxor.u32 2147483648, %v319_v6  ;;  %v154_v22 = vsel %vm33_vm3, %v153_v9, %v152_v14  ;;  %v831_v29 = vld [vmem:[%s1954_s2 + $0x500] sm:$0xff]  ;;  %v806_v14 = vld [vmem:[%s1954_s2 + $0x438] sm:$0xff] }
  0x88   :  { %v157_v56 = vsel %vm1715_vm4, %v1494_v49, %v154_v22  ;;  %984 = vmatpush.msrb.mxu1 %v831_v29  ;;  %v764_v49 = vld [vmem:[%s1954_s2 + $0x2e8] sm:$0xff]  ;;  %v758_v9 = vld [vmem:[%s1954_s2 + $0x2b8] sm:$0xff] }
  0x89   :  { %v332_v10 = vxor.u32 2147483648, %v327_v12  ;;  %v336_v8 = vsel %vm334_vm12, %v335_v48, %v327_v12  ;;  %v646_v21 = vsel %vm644_vm2, %v335_v48, %v327_v12  ;;  %v159_v3 = vmul.f32 %v157_v56, %v157_v56  ;;  %v748_v29 = vld [vmem:[%s1954_s2 + $0x268] sm:$0xff] }
  0x8a   :  { %vm485_vm12 = vcmp.lt.s32.totalorder %v484_v54, 2  ;;  %v740_v54 = vld [vmem:[%s1954_s2 + $0x228] sm:$0xff] }
  0x8b   :  { %v333_v15 = vsel %vm331_vm13, %v319_v6, %v332_v10  ;;  %v643_v19 = vsel %vm641_vm1, %v319_v6, %v332_v10  ;;  %v160_v32 = vmul.f32 -0.001358992, %v159_v3  ;;  %v167_v20 = vmul.f32 -0.00019511016, %v159_v3  ;;  %v810_v6 = vld [vmem:[%s1954_s2 + $0x458] sm:$0xff] }
  0x8c   :  { %v337_v16 = vsel %vm330_vm14, %v333_v15, %v336_v8  ;;  %v647_v60 = vsel %vm640_vm5, %v643_v19, %v646_v21  ;;  %v762_v10 = vld [vmem:[%s1954_s2 + $0x2d8] sm:$0xff]  ;;  %v760_v15 = vld [vmem:[%s1954_s2 + $0x2c8] sm:$0xff]  ;;  %vm1116_vm13 = vcmask 523268  }
  0x8d   :  { %v338_v18 = vsel %vm328_vm15, nan, %v337_v16  ;;  %v648_v26 = vsel %vm328_vm15, nan, %v647_v60  ;;  %v161_v35 = vadd.f32 0.041655596, %v160_v32  ;;  %v168_v36 = vadd.f32 0.008332121, %v167_v20  ;;  %vm1117_vm14 = vmor %vm1116_vm13, %vm26_vm0 }
  0x8e   :  { %653 = vst [vmem:[#allocation1 + $0x10] ss:$2 sm:$0xff] %v338_v18  ;;  %v794_v8 = vld [vmem:[%s1954_s2 + $0x3d8] sm:$0xff]  ;;  %v792_v16 = vld [vmem:[%s1954_s2 + $0x3c8] sm:$0xff] }
  0x8f   :  { %v162_v39 = vmul.f32 %v161_v35, %v159_v3  ;;  %v169_v44 = vmul.f32 %v168_v36, %v159_v3  ;;  %v804_v19 = vld [vmem:[%s1954_s2 + $0x428] sm:$0xff]  ;;  %v790_v60 = vld [vmem:[%s1954_s2 + $0x3b8] sm:$0xff] }
  0x90   :  { %v858_v32 = vld [vmem:[%s1954_s2 + $0x5d8] sm:$0xff]  ;;  %v752_v35 = vld [vmem:[%s1954_s2 + $0x288] sm:$0xff] }
  0x91   :  { %v163_v42 = vadd.f32 -0.4999988, %v162_v39  ;;  %v170_v40 = vadd.f32 -0.16666654, %v169_v44  ;;  %v754_v20 = vld [vmem:[%s1954_s2 + $0x298] sm:$0xff]  ;;  %v784_v44 = vld [vmem:[%s1954_s2 + $0x388] sm:$0xff] }
  0x92   :  { %v786_v36 = vld [vmem:[%s1954_s2 + $0x398] sm:$0xff] }
  0x93   :  { %v164_v50 = vmul.f32 %v163_v42, %v159_v3  ;;  %v171_v51 = vmul.f32 %v170_v40, %v159_v3  ;;  %v802_v3 = vld [vmem:[%s1954_s2 + $0x418] sm:$0xff] }
  0x94   :  { %v750_v39 = vld [vmem:[%s1954_s2 + $0x278] sm:$0xff] }
  0x95   :  { %v1735_v37 = vld.sshfl [vmem:[#allocation1 + $0x10] sm:$0xff pattern:$0x75316420]  ;;  %v165_v25 = vadd.f32 1.0, %v164_v50  ;;  %v172_v0 = vadd.f32 1.0, %v171_v51  ;;  %v782_v42 = vld [vmem:[%s1954_s2 + $0x378] sm:$0xff] }
  0x96   :  { %664 = vst [vmem:[#allocation1 + $0x10] ss:$2 sm:$0xff] %v648_v26  ;;  %925 = vmatmul.f32.vlgmr.msra.gmra.mxu2 %v1735_v37  ;;  %v788_v26 = vld [vmem:[%s1954_s2 + $0x3a8] sm:$0xff]  ;;  %v850_v40 = vld [vmem:[%s1954_s2 + $0x598] sm:$0xff] }
  0x97   :  { %1069 = vmatpush.msra.mxu2 %v830_v31  ;;  %v173_v57 = vmul.f32 %v172_v0, %v157_v56  ;;  %v181_v30 = vxor.u32 2147483648, %v165_v25  ;;  %v756_v56 = vld [vmem:[%s1954_s2 + $0x2a8] sm:$0xff]  ;;  %v778_v51 = vld [vmem:[%s1954_s2 + $0x358] sm:$0xff] }
  0x98   :  { %v856_v31 = vld [vmem:[%s1954_s2 + $0x5c8] sm:$0xff] }
  0x99   :  { %1070 = vmatpush.msra.mxu2 %v828_v24  ;;  %v178_v59 = vxor.u32 2147483648, %v173_v57  ;;  %v182_v61 = vsel %vm180_vm6, %v181_v30, %v173_v57  ;;  %v491_v55 = vsel %vm489_vm11, %v181_v30, %v173_v57  ;;  %v852_v24 = vld [vmem:[%s1954_s2 + $0x5a8] sm:$0xff]  ;;  %v774_v57 = vld [vmem:[%s1954_s2 + $0x338] sm:$0xff] }
  0x9a   :  { %v744_v50 = vld [vmem:[%s1954_s2 + $0x248] sm:$0xff]  ;;  %v842_v30 = vld [vmem:[%s1954_s2 + $0x558] sm:$0xff] }
  0x9b   :  { %1071 = vmatpush.msra.mxu2 %v826_v45  ;;  %v179_v63 = vsel %vm177_vm7, %v165_v25, %v178_v59  ;;  %v488_v43 = vsel %vm486_vm10, %v165_v25, %v178_v59  ;;  %v746_v45 = vld [vmem:[%s1954_s2 + $0x258] sm:$0xff]  ;;  %v776_v0 = vld [vmem:[%s1954_s2 + $0x348] sm:$0xff] }
  0x9c   :  { %v183_v33 = vsel %vm176_vm8, %v179_v63, %v182_v61  ;;  %v492_v4 = vsel %vm485_vm12, %v488_v43, %v491_v55  ;;  %v742_v25 = vld [vmem:[%s1954_s2 + $0x238] sm:$0xff]  ;;  %v772_v59 = vld [vmem:[%s1954_s2 + $0x328] sm:$0xff] }
  0x9d   :  { %1072 = vmatpush.msra.mxu2 %v824_v52  ;;  %v184_v34 = vsel %vm174_vm9, nan, %v183_v33  ;;  %v493_v7 = vsel %vm174_vm9, nan, %v492_v4  ;;  %v1814_v18 = vld.sshfl [vmem:[#allocation1 + $0x10] sm:$0xff pattern:$0x75316420]  ;;  %v846_v52 = vld [vmem:[%s1954_s2 + $0x578] sm:$0xff] }
  0x9e   :  { %651 = vst [vmem:[#allocation1] ss:$2 sm:$0xff] %v184_v34  ;;  %v840_v61 = vld [vmem:[%s1954_s2 + $0x548] sm:$0xff]  ;;  %v770_v63 = vld [vmem:[%s1954_s2 + $0x318] sm:$0xff]  ;;  %v863_v4 = vld [vmem:[%s1957_s3] sm:$0x3] }
  0x9f   :  { %1073 = vmatpush.msra.mxu2 %v822_v53  ;;  %v844_v53 = vld [vmem:[%s1954_s2 + $0x568] sm:$0xff]  ;;  %v834_v43 = vld [vmem:[%s1954_s2 + $0x518] sm:$0xff] }
  0xa0   :  { %v768_v33 = vld [vmem:[%s1954_s2 + $0x308] sm:$0xff] }
  0xa1   :  { %1074 = vmatpush.msra.mxu2 %v820_v58  ;;  %v738_v58 = vld [vmem:[%s1954_s2 + $0x218] sm:$0xff]  ;;  %v836_v34 = vld [vmem:[%s1954_s2 + $0x528] sm:$0xff] }
  0xa2   :  { %v832_v55 = vld [vmem:[%s1954_s2 + $0x508] sm:$0xff] }
  0xa3   :  { %1075 = vmatpush.msra.mxu2 %v818_v62  ;;  %v736_v62 = vld [vmem:[%s1954_s2 + $0x208] sm:$0xff] }
  0xa5   :  { %1076 = vmatpush.msra.mxu2 %v816_v1  ;;  %v654_v12 = vld.sshfl [vmem:[#allocation1] sm:$0xff pattern:$0x75316420]  ;;  %v655_v48 = vld.sshfl [vmem:[#allocation1 + $0x8] sm:$0xff pattern:$0x75316420] }
  0xa6   :  { %662 = vst [vmem:[#allocation1] ss:$2 sm:$0xff] %v493_v7  ;;  %885 = vmatmul.f32.vlgmr.msra.gmra.mxu0 %v654_v12  ;;  %905 = vmatmul.f32.vlgmr.msra.gmra.mxu1 %v655_v48  ;;  %v838_v1 = vld [vmem:[%s1954_s2 + $0x538] sm:$0xff]  ;;  %v865_v7 = vperm.slane %v863_v4, 0 }
  0xa7   :  { %1077 = vmatpush.msra.mxu2 %v814_v2  ;;  %1029 = vmatpush.msra.mxu0 %v766_v38  ;;  %v866_v38 = vperm.slane %v863_v4, 1 }
  0xa8   :  { %1049 = vmatpush.msra.mxu1 %v798_v11  ;;  %1005 = vmatmul.f32.vlgmr.msrb.gmra.mxu2 %v654_v12 }
  0xa9   :  { %1078 = vmatpush.msra.mxu2 %v812_v5  ;;  %1030 = vmatpush.msra.mxu0 %v764_v49 }
  0xaa   :  { %1050 = vmatpush.msra.mxu1 %v796_v13 }
  0xab   :  { %1079 = vmatpush.msra.mxu2 %v810_v6  ;;  %1031 = vmatpush.msra.mxu0 %v762_v10 }
  0xac   :  { %1051 = vmatpush.msra.mxu1 %v794_v8 }
  0xad   :  { %1080 = vmatpush.msra.mxu2 %v808_v41  ;;  %v1819_v21 = vld.sshfl [vmem:[#allocation1] sm:$0xff pattern:$0x75316420]  ;;  %1032 = vmatpush.msra.mxu0 %v760_v15  ;;  %v666_v22 = vld.sshfl [vmem:[#allocation1 + $0x8] sm:$0xff pattern:$0x75316420] }
  0xae   :  { %1052 = vmatpush.msra.mxu1 %v792_v16  ;;  %945 = vmatmul.f32.vlgmr.msra.gmra.mxu3 %v1819_v21 }
  0xaf   :  { %1081 = vmatpush.msra.mxu2 %v806_v14  ;;  %965 = vmatmul.f32.vlgmr.msrb.gmra.mxu0 %v666_v22 }
  0xb0   :  { %1089 = vmatpush.msra.mxu3 %v862_v17  ;;  %1033 = vmatpush.msra.mxu0 %v758_v9 }
  0xb1   :  { %985 = vmatmul.f32.vlgmr.msrb.gmra.mxu1 %v1814_v18  ;;  %1082 = vmatpush.msra.mxu2 %v804_v19 }
  0xb2   :  { %1090 = vmatpush.msra.mxu3 %v860_v23  ;;  %1034 = vmatpush.msra.mxu0 %v756_v56 }
  0xb3   :  { %1053 = vmatpush.msra.mxu1 %v790_v60  ;;  %1083 = vmatpush.msra.mxu2 %v802_v3 }
  0xb4   :  { %1091 = vmatpush.msra.mxu3 %v858_v32  ;;  %1035 = vmatpush.msra.mxu0 %v754_v20 }
  0xb5   :  { %1054 = vmatpush.msra.mxu1 %v788_v26  ;;  %1084 = vmatpush.msra.mxu2 %v800_v28 }
  0xb6   :  { %1092 = vmatpush.msra.mxu3 %v856_v31  ;;  %1036 = vmatpush.msra.mxu0 %v752_v35 }
  0xb7   :  { %1055 = vmatpush.msra.mxu1 %v786_v36  ;;  %1025 = vmatmul.f32.vlgmr.msrb.gmra.mxu3 %v655_v48 }
  0xb8   :  { %1093 = vmatpush.msra.mxu3 %v854_v27  ;;  %1037 = vmatpush.msra.mxu0 %v750_v39 }
  0xb9   :  { %1056 = vmatpush.msra.mxu1 %v784_v44  ;;  %1085 = vmatmul.f32.vlgmr.msra.gmra.mxu2 %v666_v22 }
  0xba   :  { %1094 = vmatpush.msra.mxu3 %v852_v24  ;;  %1038 = vmatpush.msra.mxu0 %v748_v29 }
  0xbb   :  { %1057 = vmatpush.msra.mxu1 %v782_v42 }
  0xbc   :  { %1095 = vmatpush.msra.mxu3 %v850_v40  ;;  %1039 = vmatpush.msra.mxu0 %v746_v45 }
  0xbd   :  { %1058 = vmatpush.msra.mxu1 %v780_v46 }
  0xbe   :  { %1096 = vmatpush.msra.mxu3 %v848_v47  ;;  %1040 = vmatpush.msra.mxu0 %v744_v50 }
  0xbf   :  { %1059 = vmatpush.msra.mxu1 %v778_v51 }
  0xc0   :  { %1097 = vmatpush.msra.mxu3 %v846_v52  ;;  %1041 = vmatpush.msra.mxu0 %v742_v25 }
  0xc1   :  { %1060 = vmatpush.msra.mxu1 %v776_v0 }
  0xc2   :  { %1098 = vmatpush.msra.mxu3 %v844_v53  ;;  %1042 = vmatpush.msra.mxu0 %v740_v54 }
  0xc3   :  { %1061 = vmatpush.msra.mxu1 %v774_v57 }
  0xc4   :  { %1099 = vmatpush.msra.mxu3 %v842_v30  ;;  %1043 = vmatpush.msra.mxu0 %v738_v58 }
  0xc5   :  { %1062 = vmatpush.msra.mxu1 %v772_v59 }
  0xc6   :  { %1100 = vmatpush.msra.mxu3 %v840_v61  ;;  %1044 = vmatpush.msra.mxu0 %v736_v62 }
  0xc7   :  { %1063 = vmatpush.msra.mxu1 %v770_v63  ;;  %1045 = vmatmul.f32.vlgmr.msra.gmra.mxu0 %v1735_v37 }
  0xc8   :  { %1101 = vmatpush.msra.mxu3 %v838_v1 }
  0xc9   :  { %1064 = vmatpush.msra.mxu1 %v768_v33 }
  0xca   :  { %1102 = vmatpush.msra.mxu3 %v836_v34  ;;  %1065 = vmatmul.f32.vlgmr.msra.gmra.mxu1 %v1819_v21 }
  0xcc   :  { %1103 = vmatpush.msra.mxu3 %v834_v43 }
  0xce   :  { %1104 = vmatpush.msra.mxu3 %v832_v55 }
  0xcf   :  { %1105 = vmatmul.f32.vlgmr.msra.gmra.mxu3 %v1814_v18 }
 0x119   :  { %v926_v5 = vpop.f32.mrf.mxu2 }
 0x123   :  { %v886_v2 = vpop.f32.mrf.mxu0  ;;  %v906_v37 = vpop.f32.mrf.mxu1 }
 0x124   :  { %v887_v12 = vadd.f32 %v886_v2, %v865_v7 }
 0x126   :  { %v907_v10 = vadd.f32 %v906_v37, %v887_v12 }
 0x128   :  { %v927_v15 = vadd.f32 %v926_v5, %v907_v10 }
 0x12b   :  { %v1006_v41 = vpop.f32.mrf.mxu2 }
 0x12c   :  { %v966_v11 = vpop.f32.mrf.mxu0  ;;  %v1007_v48 = vadd.f32 %v1006_v41, %v866_v38 }
 0x12e   :  { %v986_v49 = vpop.f32.mrf.mxu1 }
 0x131   :  { %v946_v6 = vpop.f32.mrf.mxu3 }
 0x132   :  { %v947_v9 = vadd.f32 %v946_v6, %v927_v15 }
 0x134   :  { %v967_v21 = vadd.f32 %v966_v11, %v947_v9 }
 0x136   :  { %v987_v56 = vadd.f32 %v986_v49, %v967_v21 }
 0x138   :  { %v1109_v32 = vmax.f32 %v987_v56, 0.0 }
 0x13a   :  { %v1026_v13 = vpop.f32.mrf.mxu3 }
 0x13b   :  { %v1027_v8 = vadd.f32 %v1026_v13, %v1007_v48 }
 0x13c   :  { %v1086_v19 = vpop.f32.mrf.mxu2 }
 0x144   :  { %v1046_v14 = vpop.f32.mrf.mxu0 }
 0x145   :  { %v1047_v16 = vadd.f32 %v1046_v14, %v1027_v8 }
 0x147   :  { %v1066_v17 = vpop.f32.mrf.mxu1 }
 0x148   :  { %v1067_v18 = vadd.f32 %v1066_v17, %v1047_v16 }
 0x14a   :  { %v1087_v22 = vadd.f32 %v1086_v19, %v1067_v18 }
 0x152   :  { %v1106_v23 = vpop.f32.mrf.mxu3 }
 0x153   :  { %v1107_v60 = vadd.f32 %v1106_v23, %v1087_v22 }
 0x155   :  { %v1110_v3 = vmax.f32 %v1107_v60, 0.0 }
 0x157   :  { %v1113_v20 = vrot.slane %v1110_v3, 4 }
 0x159   :  { %v1114_v26 = vsel %vm26_vm0, %v1109_v32, %v1113_v20 }
 0x15a   :  { %1118 = vst.msk [vmem:[%s1958_s4] sm:$0xff] %vm1117_vm14, %v1114_v26 }

</bundles_post_ra>
